<compile_context>
chip_gen: v6e
topology: v6e:2x2x1
jax: 0.10.0
libtpu: 0.0.40
codegen_flags: <defaults>
</compile_context>

<pallas_src>
import functools

import jax
import jax.numpy as jnp
from jax import lax
from jax.experimental import pallas as pl
from jax.experimental.pallas import tpu as pltpu

_LANES = 128
_TILE_INPUT_BUDGET = 8 * 1024 * 1024   # bytes: 2 inputs x 2 pipeline buffers
_MAX_TILE_N = 2048


def _choose_tile_n(n, d, itemsize, max_tile_n=None):
    """Batch-tile size: multiple of 128, double-buffered inputs within budget."""
    cap = _TILE_INPUT_BUDGET // max(1, 4 * d * itemsize)
    cap = max(_LANES, (cap // _LANES) * _LANES)
    cap = min(cap, _MAX_TILE_N)
    if max_tile_n is not None:
        cap = max(_LANES, min(cap, (max_tile_n // _LANES) * _LANES))
    if n <= cap:
        return n, 1           # single full-array block: no alignment constraints
    return cap, pl.cdiv(n, cap)


def _contrastive_kernel(o1_ref, o2_ref, t_ref, dist_ref, loss_ref, *, margin, eps):
    # o1_ref, o2_ref: (TILE_N, D) in native dtype; t_ref: (1, TILE_N) f32
    # dist_ref, loss_ref: (1, TILE_N) f32  (lane-dense outputs)
    o1 = o1_ref[...].astype(jnp.float32)
    o2 = o2_ref[...].astype(jnp.float32)
    diff = o2 - o1
    sq = diff * diff                                       # (TILE_N, D), VPU

    # Row-wise sum over D on the MXU: contract the last dims of ones(1,D) and
    # sq(TILE_N,D) -> (1, TILE_N). Keeps the XLU free and the result comes out
    # lane-dense, so the stores below are wide, unmasked vst's.
    ones_row = jnp.ones((1, sq.shape[1]), dtype=jnp.float32)
    d_row = lax.dot_general(
        ones_row, sq,
        dimension_numbers=(((1,), (1,)), ((), ())),
        preferred_element_type=jnp.float32)                # (1, TILE_N)
    dist_ref[...] = d_row

    t = t_ref[...]                                         # (1, TILE_N)
    hinge = jnp.maximum(margin - jnp.sqrt(d_row + eps), 0.0)
    loss_ref[...] = 0.5 * (t * d_row + (1.0 - t) * (hinge * hinge))


def contrastive_loss(output1, output2, target, margin, size_average=True,
                     eps=1e-9, max_tile_n=None):
    """Pallas implementation of ContrastiveLoss.forward.

    output1, output2: (N, D) float32 / bfloat16 embeddings
    target:           (N,)   1 = same class, 0 = different
    Returns (loss_scalar, distances[N]) exactly like the PyTorch module.
    """
    n, d = output1.shape
    assert output2.shape == (n, d)
    # Target is tiny; carry it as a lane-dense (1, N) f32 row.
    t_row = target.astype(jnp.float32).reshape(1, n)

    itemsize = jnp.dtype(output1.dtype).itemsize
    tile_n, num_tiles = _choose_tile_n(n, d, itemsize, max_tile_n)

    kernel = functools.partial(_contrastive_kernel,
                               margin=float(margin), eps=float(eps))

    distances, losses = pl.pallas_call(
        kernel,
        grid=(num_tiles,),
        in_specs=[
            pl.BlockSpec((tile_n, d), lambda i: (i, 0)),   # output1 slab
            pl.BlockSpec((tile_n, d), lambda i: (i, 0)),   # output2 slab
            pl.BlockSpec((1, tile_n), lambda i: (0, i)),   # target row
        ],
        out_specs=[
            pl.BlockSpec((1, tile_n), lambda i: (0, i)),   # distances row
            pl.BlockSpec((1, tile_n), lambda i: (0, i)),   # per-row losses
        ],
        out_shape=[
            jax.ShapeDtypeStruct((1, n), jnp.float32),
            jax.ShapeDtypeStruct((1, n), jnp.float32),
        ],
        compiler_params=pltpu.CompilerParams(
            dimension_semantics=("parallel",),             # tiles are independent
            vmem_limit_bytes=32 * 1024 * 1024,
        ),
    )(output1, output2, t_row)

    # Final O(N) reduction of the per-row losses (keeps the grid axis parallel
    # across v7x's two TensorCores; negligible vs the 2*N*D HBM read).
    loss = jnp.sum(losses)
    if size_average:
        loss = loss / jnp.float32(n)
    return loss, distances.reshape(n)


def _reference(output1, output2, target, margin, size_average=True, eps=1e-9):
    distances = jnp.sum((output2.astype(jnp.float32)
                         - output1.astype(jnp.float32)) ** 2, axis=1)
    tf = target.astype(jnp.float32)
    hinge = jnp.maximum(margin - jnp.sqrt(distances + eps), 0.0)
    losses = 0.5 * (tf * distances + (1.0 - tf) * hinge ** 2)
    return (jnp.mean(losses) if size_average else jnp.sum(losses)), distances


if __name__ == "__main__":
    key = jax.random.PRNGKey(0)
    k1, k2, k3, k4, k5, k6 = jax.random.split(key, 6)
    margin = 1.0

    # Small demo shape consistent with the module: batch of 8 pairs, dim 32.
    N, D = 8, 32
    o1 = jax.random.normal(k1, (N, D), dtype=jnp.float32)
    o2 = jax.random.normal(k2, (N, D), dtype=jnp.float32)
    tgt = jax.random.bernoulli(k3, 0.5, (N,)).astype(jnp.int32)

    loss, dist = contrastive_loss(o1, o2, tgt, margin, size_average=True)
    jax.block_until_ready((loss, dist))
    ref_loss, ref_dist = _reference(o1, o2, tgt, margin, size_average=True)
    assert jnp.allclose(loss, ref_loss, atol=1e-5, rtol=1e-5), (loss, ref_loss)
    assert jnp.allclose(dist, ref_dist, atol=1e-5, rtol=1e-5)

    # Also exercise the tiled path (multiple blocks + ragged last tile).
    N2, D2 = 300, 64
    o1b = jax.random.normal(k4, (N2, D2), dtype=jnp.float32)
    o2b = jax.random.normal(k5, (N2, D2), dtype=jnp.float32)
    tgtb = jax.random.bernoulli(k6, 0.5, (N2,)).astype(jnp.int32)

    loss2, dist2 = contrastive_loss(o1b, o2b, tgtb, margin, size_average=False,
                                    max_tile_n=128)
    jax.block_until_ready((loss2, dist2))
    ref_loss2, ref_dist2 = _reference(o1b, o2b, tgtb, margin, size_average=False)
    assert jnp.allclose(loss2, ref_loss2, atol=1e-4, rtol=1e-4), (loss2, ref_loss2)
    assert jnp.allclose(dist2, ref_dist2, atol=1e-4, rtol=1e-5)

    print("KERNEL_OK")
</pallas_src>

<mosaic_0001>
module attributes {stable_mosaic.version = 11 : i64} {
  func.func @_contrastive_kernel(%arg0: i32, %arg1: memref<8x32xf32, #tpu.memory_space<vmem>>, %arg2: memref<8x32xf32, #tpu.memory_space<vmem>>, %arg3: memref<1x8xf32, #tpu.memory_space<vmem>>, %arg4: memref<1x8xf32, #tpu.memory_space<vmem>>, %arg5: memref<1x8xf32, #tpu.memory_space<vmem>>) attributes {dimension_semantics = [#tpu.dimension_semantics<parallel>], iteration_bounds = array<i64: 1>, scalar_prefetch = 0 : i64, scratch_operands = 0 : i64, tpu.core_type = #tpu.core_type<tc>, window_params = [{transform_indices = @transform_0, window_bounds = array<i64: 8, 32>}, {transform_indices = @transform_1, window_bounds = array<i64: 8, 32>}, {transform_indices = @transform_2, window_bounds = array<i64: 1, 8>}, {transform_indices = @transform_3, window_bounds = array<i64: 1, 8>}, {transform_indices = @transform_4, window_bounds = array<i64: 1, 8>}]} {
    %c0 = arith.constant 0 : index
    %c0_0 = arith.constant 0 : index
    %0 = vector.load %arg1[%c0, %c0_0] : memref<8x32xf32, #tpu.memory_space<vmem>>, vector<8x32xf32>
    %c0_1 = arith.constant 0 : index
    %c0_2 = arith.constant 0 : index
    %1 = vector.load %arg2[%c0_1, %c0_2] : memref<8x32xf32, #tpu.memory_space<vmem>>, vector<8x32xf32>
    %2 = arith.subf %1, %0 : vector<8x32xf32>
    %3 = arith.mulf %2, %2 : vector<8x32xf32>
    %cst = arith.constant 1.000000e+00 : f32
    %4 = vector.broadcast %cst : f32 to vector<1x32xf32>
    %cst_3 = arith.constant dense<0.000000e+00> : vector<1x8xf32>
    %5 = tpu.matmul %4, %3, %cst_3 {dimension_numbers = #tpu.dot_dimension_numbers<[1], [1], [0], [0], [0, 0, 1, 0], [], []>} : vector<1x32xf32>, vector<8x32xf32>, vector<1x8xf32> -> vector<1x8xf32>
    %c0_4 = arith.constant 0 : index
    %c0_5 = arith.constant 0 : index
    %6 = vector.load %arg4[%c0_4, %c0_5] : memref<1x8xf32, #tpu.memory_space<vmem>>, vector<1x8xf32>
    tpu.vector_store %arg4[%c0_4, %c0_5], %5 {strides = array<i32>} : memref<1x8xf32, #tpu.memory_space<vmem>>, vector<1x8xf32>,
    %c0_6 = arith.constant 0 : index
    %c0_7 = arith.constant 0 : index
    %7 = vector.load %arg3[%c0_6, %c0_7] : memref<1x8xf32, #tpu.memory_space<vmem>>, vector<1x8xf32>
    %cst_8 = arith.constant 9.99999971E-10 : f32
    %8 = vector.broadcast %cst_8 : f32 to vector<1x8xf32>
    %9 = arith.addf %5, %8 : vector<1x8xf32>
    %10 = math.sqrt %9 : vector<1x8xf32>
    %cst_9 = arith.constant 1.000000e+00 : f32
    %11 = vector.broadcast %cst_9 : f32 to vector<1x8xf32>
    %12 = arith.subf %11, %10 : vector<1x8xf32>
    %cst_10 = arith.constant 0.000000e+00 : f32
    %13 = vector.broadcast %cst_10 : f32 to vector<1x8xf32>
    %14 = arith.maximumf %12, %13 : vector<1x8xf32>
    %15 = arith.mulf %7, %5 : vector<1x8xf32>
    %cst_11 = arith.constant 1.000000e+00 : f32
    %16 = vector.broadcast %cst_11 : f32 to vector<1x8xf32>
    %17 = arith.subf %16, %7 : vector<1x8xf32>
    %18 = arith.mulf %14, %14 : vector<1x8xf32>
    %19 = arith.mulf %17, %18 : vector<1x8xf32>
    %20 = arith.addf %15, %19 : vector<1x8xf32>
    %cst_12 = arith.constant 5.000000e-01 : f32
    %21 = vector.broadcast %cst_12 : f32 to vector<1x8xf32>
    %22 = arith.mulf %21, %20 : vector<1x8xf32>
    %c0_13 = arith.constant 0 : index
    %c0_14 = arith.constant 0 : index
    %23 = vector.load %arg5[%c0_13, %c0_14] : memref<1x8xf32, #tpu.memory_space<vmem>>, vector<1x8xf32>
    tpu.vector_store %arg5[%c0_13, %c0_14], %22 {strides = array<i32>} : memref<1x8xf32, #tpu.memory_space<vmem>>, vector<1x8xf32>,
    return
  }
  func.func @transform_0(%arg0: i32) -> (i32, i32) {
    %c0_i32 = arith.constant 0 : i32
    %c0_i32_0 = arith.constant 0 : i32
    return %arg0, %c0_i32 : i32, i32
  }
  func.func @transform_1(%arg0: i32) -> (i32, i32) {
    %c0_i32 = arith.constant 0 : i32
    %c0_i32_0 = arith.constant 0 : i32
    return %arg0, %c0_i32 : i32, i32
  }
  func.func @transform_2(%arg0: i32) -> (i32, i32) {
    %c0_i32 = arith.constant 0 : i32
    %c0_i32_0 = arith.constant 0 : i32
    return %c0_i32, %arg0 : i32, i32
  }
  func.func @transform_3(%arg0: i32) -> (i32, i32) {
    %c0_i32 = arith.constant 0 : i32
    %c0_i32_0 = arith.constant 0 : i32
    return %c0_i32, %arg0 : i32, i32
  }
  func.func @transform_4(%arg0: i32) -> (i32, i32) {
    %c0_i32 = arith.constant 0 : i32
    %c0_i32_0 = arith.constant 0 : i32
    return %c0_i32, %arg0 : i32, i32
  }
}

</mosaic_0001>

<bundles_post_ra>
// kernel: tpu_custom_call.1
= control target key start
LH: loop header
LB: loop body
LE: loop exit
PB: predicated region body
PF: predicated region fallthrough
CT: control target
= control target key end

     0   :  { %10 = vsyncpa [#allocation3], 0  ;;  %s328_s0 = inlined_call_operand.hbm [shape: f32[8,32], index: 0, kind: input, shape index: {}]   ;;  %s329_s1 = inlined_call_operand.hbm [shape: f32[8,32], index: 1, kind: input, shape index: {}]   ;;  %s330_s2 = inlined_call_operand.vmem [shape: f32[1,8], index: 2, kind: input, shape index: {}]   ;;  %s331_s3 = inlined_call_operand.hbm [shape: f32[1,8], index: 3, kind: output, shape index: {0}]   ;;  %s332_s4 = inlined_call_operand.hbm [shape: f32[1,8], index: 4, kind: output, shape index: {1}]  }
   0x1   :  { %11 = vsyncpa [#allocation6], 0 }
   0x2   :  { %12 = vsyncpa [#allocation4], 0 }
   0x3   :  { %13 = vsyncpa [#allocation9], 0  ;;  %s279_s15 = smov [#allocation2]   ;;  %s280_s17 = smov [#allocation5]  }
   0x4   :  { %s20_s16 = sshll.u32 %s279_s15, 4  ;;  %s30_s18 = sshll.u32 %s280_s17, 4  ;;  %s21_s16 = int_to_ptr.vmem [resolvable:$true] %s20_s16  ;;  %s31_s18 = int_to_ptr.vmem [resolvable:$true] %s30_s18 }
   0x5   :  { %s199_s19 = scalar_lea.vmem %s21_s16, 128  ;;  %p204_p1 = scmp.lt.s32.totalorder %s21_s16, %s21_s16 }
   0x6   :  { %p200_p0 = scmp.ne.s32.totalorder %s21_s16, %s199_s19  ;;  %p205_p2 = scmp.lt.s32.totalorder %s199_s19, %s199_s19 }
   0x8   :  { %p206_p3 = por %p205_p2, %p204_p1 }
   0xa   :  { %p207_p4 = pnand %p206_p3, %p200_p0 }
   0xc   :  { %210 = shalt.err (!%p207_p4)
}
   0xd   :  { %23 = dma.hbm_to_vmem [thread:$0]  %s328_s0, 128, %s21_s16, [#allocation3]  }
   0xe   :  { %s219_s22 = scalar_lea.vmem %s31_s18, 128  ;;  %p224_p6 = scmp.lt.s32.totalorder %s31_s18, %s31_s18 }
   0xf   :  { %p220_p5 = scmp.ne.s32.totalorder %s31_s18, %s219_s22  ;;  %p225_p7 = scmp.lt.s32.totalorder %s219_s22, %s219_s22 }
  0x11   :  { %p226_p8 = por %p225_p7, %p224_p6 }
  0x13   :  { %p227_p9 = pnand %p226_p8, %p220_p5 }
  0x15   :  { %230 = shalt.err (!%p227_p9)
}
  0x16   :  { %33 = dma.hbm_to_vmem [thread:$0]  %s329_s1, 128, %s31_s18, [#allocation6]  }
  0x17   :  { %271 = dma.done.wait [#allocation3], 128  }
  0x18   :  { %272 = vsyncadd [#allocation3], 4294967168 }
  0x19   :  { %273 = dma.done.wait [#allocation6], 128  }
  0x1a   :  { %274 = vsyncadd [#allocation6], 4294967168  ;;  %v281_v0 = vmov 0.0   ;;  %vm282_vm0 = vmmov 0   ;;  %v42_v1 = vld [vmem:[#allocation2] sm:$0xff]  ;;  %v43_v2 = vld [vmem:[#allocation5] sm:$0xff] }
  0x1b   :  { %177 = vmatprep.subr.mxu0 %v281_v0  ;;  %179 = vmatprep.mubr.msk.f32.mxu0 %vm282_vm0, %v281_v0  ;;  %v44_v3 = vsub.f32 %v43_v2, %v42_v1  ;;  %vm46_vm1 = vcmask 261120   ;;  %v283_v5 = vmov 1.0   ;;  %s284_s0 = smov [#allocation7]   ;;  %vm123_vm2 = vcmask 57344  }
  0x1c   :  { %s149_s25 = sshll.u32 %s284_s0, 4  ;;  %s150_s25 = int_to_ptr.vmem [resolvable:$true] %s149_s25 }
  0x1d   :  { %v45_v4 = vmul.f32 %v44_v3, %v44_v3  ;;  %s231_s1 = scalar_lea.vmem %s150_s25, 16  ;;  %s235_s26 = scalar_lea.vmem %s150_s25, 32 }
  0x1e   :  { %p232_p10 = scmp.ne.s32.totalorder %s150_s25, %s231_s1  ;;  %p236_p11 = scmp.lt.s32.totalorder %s150_s25, %s150_s25 }
  0x1f   :  { %178 = vmatpush3.xpose.msk.msra.mxu0 %vm46_vm1, %v45_v4  ;;  %p237_p12 = scmp.lt.s32.totalorder %s235_s26, %s231_s1 }
  0x21   :  { %p238_p13 = por %p237_p12, %p236_p11 }
  0x22   :  { %180 = vmatmul.mubr.msk.f32.vlgmr.msra.gmra.mxu0 %vm46_vm1, %v283_v5 }
  0x23   :  { %p239_p0 = pnand %p238_p13, %p232_p10 }
  0xe2   :  { %v119_v6 = vpop.f32.mrf.mxu0 }
  0xe3   :  { %v126_v7 = vadd.f32 1e-09, %v119_v6  ;;  %124 = vst.msk [vmem:[#allocation7] sm:$0x1] %vm123_vm2, %v119_v6 }
  0xe4   :  { %v181_v8 = vpop.f32.mrf.mxu0 }
  0xe5   :  { %242 = shalt.err (!%p239_p0)
}
  0xe6   :  { %152 = dma.vmem_to_hbm [thread:$0]  %s150_s25, 16, %s331_s3, [#allocation4]   ;;  %189 = vrsqrt.f32 %v126_v7  ;;  %vm129_vm3 = vcmp.eq.f32.partialorder %v126_v7, inf  ;;  %v132_v11 = vand.u32 2147483648, %v126_v7  ;;  %vm131_vm4 = vcmp.eq.f32.partialorder %v126_v7, 0.0 }
  0xe7   :  { %v125_v15 = vld [vmem:[%s330_s2] sm:$0x1]  ;;  %s285_s5 = smov [#allocation8]  }
  0xe8   :  { %v137_v17 = vsub.f32 1.0, %v125_v15  ;;  %v136_v19 = vmul.f32 %v125_v15, %v119_v6  ;;  %s159_s3 = sshll.u32 %s285_s5, 4  ;;  %s160_s3 = int_to_ptr.vmem [resolvable:$true] %s159_s3 }
  0xe9   :  { %s251_s6 = scalar_lea.vmem %s160_s3, 16  ;;  %s255_s7 = scalar_lea.vmem %s160_s3, 32 }
  0xea   :  { %p252_p1 = scmp.ne.s32.totalorder %s160_s3, %s251_s6  ;;  %p256_p2 = scmp.lt.s32.totalorder %s160_s3, %s160_s3 }
  0xeb   :  { %p257_p3 = scmp.lt.s32.totalorder %s255_s7, %s251_s6 }
  0xed   :  { %p258_p4 = por %p257_p3, %p256_p2 }
  0xef   :  { %p259_p5 = pnand %p258_p4, %p252_p1 }
  0xf3   :  { %v190_v9 = vpop.eup %189 }
  0xf4   :  { %v128_v10 = vmul.f32 %v190_v9, %v126_v7 }
  0xf6   :  { %v130_v12 = vsel %vm129_vm3, %v126_v7, %v128_v10 }
  0xf7   :  { %v133_v13 = vsel %vm131_vm4, %v132_v11, %v130_v12 }
  0xf8   :  { %v134_v14 = vsub.f32 1.0, %v133_v13 }
  0xfa   :  { %v135_v16 = vmax.f32 %v134_v14, 0.0 }
  0xfc   :  { %v138_v18 = vmul.f32 %v135_v16, %v135_v16 }
  0xfe   :  { %v139_v20 = vmul.f32 %v138_v18, %v137_v17 }
 0x100   :  { %v140_v21 = vadd.f32 %v139_v20, %v136_v19 }
 0x102   :  { %v141_v22 = vmul.f32 0.5, %v140_v21 }
 0x104   :  { %142 = vst.msk [vmem:[#allocation8] sm:$0x1] %vm123_vm2, %v141_v22 }
 0x105   :  { %262 = shalt.err (!%p259_p5)
}
 0x106   :  { %162 = dma.vmem_to_hbm [thread:$0]  %s160_s3, 16, %s332_s4, [#allocation9]  }
 0x107   :  { %275 = dma.done.wait [#allocation4], 16  }
 0x108   :  { %276 = vsyncadd [#allocation4], 4294967280 }
 0x109   :  { %277 = dma.done.wait [#allocation9], 16  }
 0x10a   :  { %278 = vsyncadd [#allocation9], 4294967280 }
 0x10b   :  { %169 = vsyncpa [#allocation3], 1 }
 0x10c   :  { %170 = vsyncpa [#allocation6], 1 }
 0x10d   :  { %171 = vsyncpa [#allocation4], 1 }
 0x10e   :  { %172 = vsyncpa [#allocation9], 1 }

</bundles_post_ra>
